<compile_context>
chip_gen: v5e
topology: v5e:2x2
jax: 0.10.0
libtpu: 0.0.40
codegen_flags: <defaults>
</compile_context>

<pallas_src>
import math

import jax
import jax.numpy as jnp
from jax.experimental import pallas as pl
from jax.experimental.pallas import tpu as pltpu

LN_EPS = 1e-5        # nn.LayerNorm default eps
NEG_BIG = -1e30      # bias for padded class columns ("-inf" that is softmax-safe)


def _round_up(n, m):
    return ((n + m - 1) // m) * m


def _nbytes(shape, dtype):
    return math.prod(shape) * jnp.dtype(dtype).itemsize


def _make_kernel(h_real):
    """Kernel closure over the *real* hidden size used for LN statistics."""
    inv_h = 1.0 / float(h_real)

    def kernel(x_ref, w1_ref, b1_ref, g_ref, beta_ref, w2_ref, b2_ref, o_ref):
        # ---- Linear 1 (MXU, f32 accumulation; x/w1 may be bf16) ----
        h = jnp.dot(x_ref[...], w1_ref[...], preferred_element_type=jnp.float32)
        h = h + b1_ref[...]

        # ---- SiLU: h * sigmoid(h)   (exp on EUP; reciprocal instead of divide) ----
        e = jnp.exp(-h)
        h = h * pl.reciprocal(1.0 + e)

        # ---- LayerNorm over the real H features.  Padded hidden columns are
        #      exactly 0 (zero weights/bias -> SiLU(0)=0), so sums over the
        #      padded width equal the sums over the real H. ----
        s1 = jnp.sum(h, axis=-1, keepdims=True)
        s2 = jnp.sum(h * h, axis=-1, keepdims=True)
        mean = s1 * inv_h
        var = s2 * inv_h - mean * mean
        hn = (h - mean) * jax.lax.rsqrt(var + LN_EPS)
        hn = hn * g_ref[...] + beta_ref[...]     # padded gamma/beta are 0 -> hn_pad = 0

        # ---- Linear 2 (MXU, f32 accumulation) ----
        w2 = w2_ref[...]
        logits = jnp.dot(hn.astype(w2.dtype), w2, preferred_element_type=jnp.float32)
        logits = logits + b2_ref[...]            # padded classes get a -1e30 bias

        # ---- Dropout: identity (eval mode) ----

        # ---- LogSoftmax over classes (dim=1 for 2-D input) ----
        m = jnp.max(logits, axis=-1, keepdims=True)
        shifted = logits - m
        lse = jnp.log(jnp.sum(jnp.exp(shifted), axis=-1, keepdims=True))
        o_ref[...] = (shifted - lse).astype(o_ref.dtype)

    return kernel


def embedding_classifier_log_output(x, w1, b1, gamma, beta, w2, b2, *,
                                    matmul_dtype=jnp.float32, tb=256):
    """x: [B, input_dim] -> log-probs [B, num_classes] (f32).

    Weights are stored [in_features, out_features] (y = x @ W + b, which equals
    PyTorch's x @ W.T with W stored [out, in]).
    """
    f32 = jnp.float32
    B, D_in = x.shape
    H = w1.shape[1]
    C = w2.shape[1]

    # Lane-dense padding: 128-multiples on every feature axis; batch to TB.
    Dp = _round_up(D_in, 128)
    Hp = _round_up(H, 128)
    Cp = _round_up(C, 128)
    TB = max(8, min(_round_up(tb, 8), _round_up(B, 8)))
    Bp = _round_up(B, TB)

    pad2 = lambda a, r, c, val=0.0: jnp.pad(a, ((0, r - a.shape[0]), (0, c - a.shape[1])),
                                            constant_values=val)
    xp = pad2(x.astype(matmul_dtype), Bp, Dp)
    w1p = pad2(w1.astype(matmul_dtype), Dp, Hp)
    w2p = pad2(w2.astype(matmul_dtype), Hp, Cp)
    b1p = pad2(b1.astype(f32)[None, :], 1, Hp)
    gp = pad2(gamma.astype(f32)[None, :], 1, Hp)
    bp = pad2(beta.astype(f32)[None, :], 1, Hp)
    # Padded class columns get a huge negative bias so they cannot influence
    # the max / sum-exp of the log-softmax.
    b2p = pad2(b2.astype(f32)[None, :], 1, Cp, val=NEG_BIG)

    grid = (Bp // TB,)

    tile = lambda shape: pl.BlockSpec(shape, lambda i: (i, 0))    # batch-tiled
    fixed = lambda shape: pl.BlockSpec(shape, lambda i: (0, 0))   # resident across steps

    # VMEM budget: double-buffered x/out tiles + (conservatively 2x) resident
    # weights/biases, plus slack for the f32 epilogue temporaries.
    foot = (2 * _nbytes((TB, Dp), matmul_dtype)
            + 2 * _nbytes((TB, Cp), f32)
            + 2 * _nbytes((Dp, Hp), matmul_dtype)
            + 2 * _nbytes((Hp, Cp), matmul_dtype)
            + 2 * (3 * _nbytes((1, Hp), f32) + _nbytes((1, Cp), f32))
            + 2 * _nbytes((TB, Hp), f32))
    vmem_limit = int(min(64 * 2**20, max(16 * 2**20, foot + (4 << 20))))

    out_padded = pl.pallas_call(
        _make_kernel(H),
        out_shape=jax.ShapeDtypeStruct((Bp, Cp), f32),
        grid=grid,
        in_specs=[
            tile((TB, Dp)),      # x
            fixed((Dp, Hp)),     # w1
            fixed((1, Hp)),      # b1
            fixed((1, Hp)),      # gamma
            fixed((1, Hp)),      # beta
            fixed((Hp, Cp)),     # w2
            fixed((1, Cp)),      # b2 (padded cols = -1e30)
        ],
        out_specs=tile((TB, Cp)),
        compiler_params=pltpu.CompilerParams(
            dimension_semantics=("parallel",),
            vmem_limit_bytes=vmem_limit),
    )(xp, w1p, b1p, gp, bp, w2p, b2p)

    return out_padded[:B, :C]


def reference(x, w1, b1, gamma, beta, w2, b2):
    h = x @ w1 + b1
    h = h * jax.nn.sigmoid(h)
    mean = h.mean(-1, keepdims=True)
    var = ((h - mean) ** 2).mean(-1, keepdims=True)
    hn = (h - mean) / jnp.sqrt(var + LN_EPS) * gamma + beta
    logits = hn @ w2 + b2
    return jax.nn.log_softmax(logits, axis=-1)


if __name__ == "__main__":
    key = jax.random.PRNGKey(0)

    def make_params(k, d_in, h, c):
        k1, k2, k3, k4, k5, k6 = jax.random.split(k, 6)
        lim1 = 1.0 / jnp.sqrt(d_in)
        w1 = jax.random.uniform(k1, (d_in, h), jnp.float32, -lim1, lim1)
        b1 = jax.random.uniform(k2, (h,), jnp.float32, -lim1, lim1)
        gamma = 1.0 + 0.1 * jax.random.uniform(k5, (h,), jnp.float32, -1.0, 1.0)
        beta = 0.1 * jax.random.uniform(k6, (h,), jnp.float32, -1.0, 1.0)
        lim2 = 1.0 / jnp.sqrt(h)
        w2 = jax.random.uniform(k3, (h, c), jnp.float32, -lim2, lim2)
        b2 = jax.random.uniform(k4, (c,), jnp.float32, -lim2, lim2)
        return w1, b1, gamma, beta, w2, b2

    # Case 1: module-scale shapes (single grid step after padding), f32 path.
    B, D_IN, HID, CLS = 8, 32, 32, 16
    kx, kp, key = jax.random.split(key, 3)
    x = jax.random.normal(kx, (B, D_IN), dtype=jnp.float32)
    params = make_params(kp, D_IN, HID, CLS)

    out = jax.block_until_ready(embedding_classifier_log_output(x, *params))
    ref = reference(x, *params)
    assert out.shape == (B, CLS)
    assert jnp.allclose(out, ref, atol=1e-4, rtol=1e-4), "f32 path mismatch"

    # bf16-weight matmul path (f32 accumulation) — looser tolerance vs f32 ref.
    out_bf16 = jax.block_until_ready(
        embedding_classifier_log_output(x, *params, matmul_dtype=jnp.bfloat16))
    assert out_bf16.shape == (B, CLS)
    assert jnp.allclose(out_bf16, ref, atol=5e-2, rtol=5e-2), "bf16 path mismatch"

    # Case 2: non-aligned shapes + multi-step batch grid (exercises padding
    # masks and the pipelined "parallel" batch axis: Bp=384, grid=(3,)).
    B2, D2, H2, C2 = 300, 80, 96, 40
    kx2, kp2, key = jax.random.split(key, 3)
    x2 = jax.random.normal(kx2, (B2, D2), dtype=jnp.float32)
    params2 = make_params(kp2, D2, H2, C2)

    out2 = jax.block_until_ready(
        embedding_classifier_log_output(x2, *params2, tb=128))
    ref2 = reference(x2, *params2)
    assert out2.shape == (B2, C2)
    assert jnp.allclose(out2, ref2, atol=1e-4, rtol=1e-4), "tiled path mismatch"

    print("KERNEL_OK")
</pallas_src>

<mosaic_0001>
module attributes {stable_mosaic.version = 11 : i64} {
  func.func @kernel(%arg0: i32, %arg1: memref<8x128xf32, #tpu.memory_space<vmem>>, %arg2: memref<128x128xf32, #tpu.memory_space<vmem>>, %arg3: memref<1x128xf32, #tpu.memory_space<vmem>>, %arg4: memref<1x128xf32, #tpu.memory_space<vmem>>, %arg5: memref<1x128xf32, #tpu.memory_space<vmem>>, %arg6: memref<128x128xf32, #tpu.memory_space<vmem>>, %arg7: memref<1x128xf32, #tpu.memory_space<vmem>>, %arg8: memref<8x128xf32, #tpu.memory_space<vmem>>) attributes {dimension_semantics = [#tpu.dimension_semantics<parallel>], iteration_bounds = array<i64: 1>, scalar_prefetch = 0 : i64, scratch_operands = 0 : i64, tpu.core_type = #tpu.core_type<tc>, window_params = [{transform_indices = @transform_0, window_bounds = array<i64: 8, 128>}, {pipeline_mode = #tpu.pipeline_mode<synchronous>, transform_indices = @transform_1, window_bounds = array<i64: 128, 128>}, {pipeline_mode = #tpu.pipeline_mode<synchronous>, transform_indices = @transform_2, window_bounds = array<i64: 1, 128>}, {pipeline_mode = #tpu.pipeline_mode<synchronous>, transform_indices = @transform_3, window_bounds = array<i64: 1, 128>}, {pipeline_mode = #tpu.pipeline_mode<synchronous>, transform_indices = @transform_4, window_bounds = array<i64: 1, 128>}, {pipeline_mode = #tpu.pipeline_mode<synchronous>, transform_indices = @transform_5, window_bounds = array<i64: 128, 128>}, {pipeline_mode = #tpu.pipeline_mode<synchronous>, transform_indices = @transform_6, window_bounds = array<i64: 1, 128>}, {transform_indices = @transform_7, window_bounds = array<i64: 8, 128>}]} {
    %c0 = arith.constant 0 : index
    %c0_0 = arith.constant 0 : index
    %0 = vector.load %arg1[%c0, %c0_0] : memref<8x128xf32, #tpu.memory_space<vmem>>, vector<8x128xf32>
    %c0_1 = arith.constant 0 : index
    %c0_2 = arith.constant 0 : index
    %1 = vector.load %arg2[%c0_1, %c0_2] : memref<128x128xf32, #tpu.memory_space<vmem>>, vector<128x128xf32>
    %cst = arith.constant dense<0.000000e+00> : vector<8x128xf32>
    %2 = tpu.matmul %0, %1, %cst {dimension_numbers = #tpu.dot_dimension_numbers<[1], [0], [0], [1], [0, 0, 1, 1], [], []>} : vector<8x128xf32>, vector<128x128xf32>, vector<8x128xf32> -> vector<8x128xf32>
    %c0_3 = arith.constant 0 : index
    %c0_4 = arith.constant 0 : index
    %3 = vector.load %arg3[%c0_3, %c0_4] : memref<1x128xf32, #tpu.memory_space<vmem>>, vector<1x128xf32>
    %4 = vector.broadcast %3 : vector<1x128xf32> to vector<8x128xf32>
    %5 = arith.addf %2, %4 : vector<8x128xf32>
    %cst_5 = arith.constant 0.000000e+00 : f32
    %6 = vector.broadcast %cst_5 : f32 to vector<8x128xf32>
    %7 = arith.subf %6, %5 : vector<8x128xf32>
    %8 = math.exp %7 : vector<8x128xf32>
    %cst_6 = arith.constant 1.000000e+00 : f32
    %9 = vector.broadcast %cst_6 : f32 to vector<8x128xf32>
    %10 = arith.addf %9, %8 : vector<8x128xf32>
    %11 = tpu.reciprocal %10 : vector<8x128xf32> -> vector<8x128xf32>
    %12 = arith.mulf %5, %11 : vector<8x128xf32>
    %cst_7 = arith.constant dense<0.000000e+00> : vector<8xf32>
    %13 = vector.multi_reduction <add>, %12, %cst_7 [1] : vector<8x128xf32> to vector<8xf32>
    %14 = vector.shape_cast %13 : vector<8xf32> to vector<8x1xf32>
    %15 = arith.mulf %12, %12 : vector<8x128xf32>
    %cst_8 = arith.constant dense<0.000000e+00> : vector<8xf32>
    %16 = vector.multi_reduction <add>, %15, %cst_8 [1] : vector<8x128xf32> to vector<8xf32>
    %17 = vector.shape_cast %16 : vector<8xf32> to vector<8x1xf32>
    %cst_9 = arith.constant 3.125000e-02 : f32
    %18 = vector.broadcast %cst_9 : f32 to vector<8x1xf32>
    %19 = arith.mulf %14, %18 : vector<8x1xf32>
    %cst_10 = arith.constant 3.125000e-02 : f32
    %20 = vector.broadcast %cst_10 : f32 to vector<8x1xf32>
    %21 = arith.mulf %17, %20 : vector<8x1xf32>
    %22 = arith.mulf %19, %19 : vector<8x1xf32>
    %23 = arith.subf %21, %22 : vector<8x1xf32>
    %24 = vector.broadcast %19 : vector<8x1xf32> to vector<8x128xf32>
    %25 = arith.subf %12, %24 : vector<8x128xf32>
    %cst_11 = arith.constant 9.99999974E-6 : f32
    %26 = vector.broadcast %cst_11 : f32 to vector<8x1xf32>
    %27 = arith.addf %23, %26 : vector<8x1xf32>
    %28 = math.rsqrt %27 : vector<8x1xf32>
    %29 = vector.broadcast %28 : vector<8x1xf32> to vector<8x128xf32>
    %30 = arith.mulf %25, %29 : vector<8x128xf32>
    %c0_12 = arith.constant 0 : index
    %c0_13 = arith.constant 0 : index
    %31 = vector.load %arg4[%c0_12, %c0_13] : memref<1x128xf32, #tpu.memory_space<vmem>>, vector<1x128xf32>
    %32 = vector.broadcast %31 : vector<1x128xf32> to vector<8x128xf32>
    %33 = arith.mulf %30, %32 : vector<8x128xf32>
    %c0_14 = arith.constant 0 : index
    %c0_15 = arith.constant 0 : index
    %34 = vector.load %arg5[%c0_14, %c0_15] : memref<1x128xf32, #tpu.memory_space<vmem>>, vector<1x128xf32>
    %35 = vector.broadcast %34 : vector<1x128xf32> to vector<8x128xf32>
    %36 = arith.addf %33, %35 : vector<8x128xf32>
    %c0_16 = arith.constant 0 : index
    %c0_17 = arith.constant 0 : index
    %37 = vector.load %arg6[%c0_16, %c0_17] : memref<128x128xf32, #tpu.memory_space<vmem>>, vector<128x128xf32>
    %cst_18 = arith.constant dense<0.000000e+00> : vector<8x128xf32>
    %38 = tpu.matmul %36, %37, %cst_18 {dimension_numbers = #tpu.dot_dimension_numbers<[1], [0], [0], [1], [0, 0, 1, 1], [], []>} : vector<8x128xf32>, vector<128x128xf32>, vector<8x128xf32> -> vector<8x128xf32>
    %c0_19 = arith.constant 0 : index
    %c0_20 = arith.constant 0 : index
    %39 = vector.load %arg7[%c0_19, %c0_20] : memref<1x128xf32, #tpu.memory_space<vmem>>, vector<1x128xf32>
    %40 = vector.broadcast %39 : vector<1x128xf32> to vector<8x128xf32>
    %41 = arith.addf %38, %40 : vector<8x128xf32>
    %cst_21 = arith.constant dense<0xFF800000> : vector<8xf32>
    %42 = vector.multi_reduction <maximumf>, %41, %cst_21 [1] : vector<8x128xf32> to vector<8xf32>
    %43 = vector.shape_cast %42 : vector<8xf32> to vector<8x1xf32>
    %44 = vector.broadcast %43 : vector<8x1xf32> to vector<8x128xf32>
    %45 = arith.subf %41, %44 : vector<8x128xf32>
    %46 = math.exp %45 : vector<8x128xf32>
    %cst_22 = arith.constant dense<0.000000e+00> : vector<8xf32>
    %47 = vector.multi_reduction <add>, %46, %cst_22 [1] : vector<8x128xf32> to vector<8xf32>
    %48 = vector.shape_cast %47 : vector<8xf32> to vector<8x1xf32>
    %49 = math.log %48 : vector<8x1xf32>
    %50 = vector.broadcast %49 : vector<8x1xf32> to vector<8x128xf32>
    %51 = arith.subf %45, %50 : vector<8x128xf32>
    %c0_23 = arith.constant 0 : index
    %c0_24 = arith.constant 0 : index
    %52 = vector.load %arg8[%c0_23, %c0_24] : memref<8x128xf32, #tpu.memory_space<vmem>>, vector<8x128xf32>
    tpu.vector_store %arg8[%c0_23, %c0_24], %51 {strides = array<i32>} : memref<8x128xf32, #tpu.memory_space<vmem>>, vector<8x128xf32>,
    return
  }
  func.func @transform_0(%arg0: i32) -> (i32, i32) {
    %c0_i32 = arith.constant 0 : i32
    %c0_i32_0 = arith.constant 0 : i32
    return %arg0, %c0_i32 : i32, i32
  }
  func.func @transform_1(%arg0: i32) -> (i32, i32) {
    %c0_i32 = arith.constant 0 : i32
    %c0_i32_0 = arith.constant 0 : i32
    %c0_i32_1 = arith.constant 0 : i32
    return %c0_i32, %c0_i32_0 : i32, i32
  }
  func.func @transform_2(%arg0: i32) -> (i32, i32) {
    %c0_i32 = arith.constant 0 : i32
    %c0_i32_0 = arith.constant 0 : i32
    %c0_i32_1 = arith.constant 0 : i32
    return %c0_i32, %c0_i32_0 : i32, i32
  }
  func.func @transform_3(%arg0: i32) -> (i32, i32) {
    %c0_i32 = arith.constant 0 : i32
    %c0_i32_0 = arith.constant 0 : i32
    %c0_i32_1 = arith.constant 0 : i32
    return %c0_i32, %c0_i32_0 : i32, i32
  }
  func.func @transform_4(%arg0: i32) -> (i32, i32) {
    %c0_i32 = arith.constant 0 : i32
    %c0_i32_0 = arith.constant 0 : i32
    %c0_i32_1 = arith.constant 0 : i32
    return %c0_i32, %c0_i32_0 : i32, i32
  }
  func.func @transform_5(%arg0: i32) -> (i32, i32) {
    %c0_i32 = arith.constant 0 : i32
    %c0_i32_0 = arith.constant 0 : i32
    %c0_i32_1 = arith.constant 0 : i32
    return %c0_i32, %c0_i32_0 : i32, i32
  }
  func.func @transform_6(%arg0: i32) -> (i32, i32) {
    %c0_i32 = arith.constant 0 : i32
    %c0_i32_0 = arith.constant 0 : i32
    %c0_i32_1 = arith.constant 0 : i32
    return %c0_i32, %c0_i32_0 : i32, i32
  }
  func.func @transform_7(%arg0: i32) -> (i32, i32) {
    %c0_i32 = arith.constant 0 : i32
    %c0_i32_0 = arith.constant 0 : i32
    return %arg0, %c0_i32 : i32, i32
  }
}

</mosaic_0001>

<bundles_post_ra>
// kernel: tpu_custom_call.1
= control target key start
LH: loop header
LB: loop body
LE: loop exit
PB: predicated region body
PF: predicated region fallthrough
CT: control target
= control target key end

     0   :  { %12 = vsyncpa [#allocation3], 0  ;;  %s425_s0 = inlined_call_operand.hbm [shape: f32[8,128], index: 0, kind: input, shape index: {}]   ;;  %s426_s1 = inlined_call_operand.hbm [shape: f32[128,128], index: 1, kind: input, shape index: {}]   ;;  %s427_s2 = inlined_call_operand.vmem [shape: f32[1,128], index: 2, kind: input, shape index: {}]   ;;  %s428_s3 = inlined_call_operand.vmem [shape: f32[1,128], index: 3, kind: input, shape index: {}]   ;;  %s429_s4 = inlined_call_operand.vmem [shape: f32[1,128], index: 4, kind: input, shape index: {}]   ;;  %s430_s5 = inlined_call_operand.hbm [shape: f32[128,128], index: 5, kind: input, shape index: {}]   ;;  %s431_s6 = inlined_call_operand.vmem [shape: f32[1,128], index: 6, kind: input, shape index: {}]   ;;  %s432_s7 = inlined_call_operand.hbm [shape: f32[8,128], index: 7, kind: output, shape index: {}]  }
   0x1   :  { %13 = vsyncpa [#allocation6], 0  ;;  %s30_s26 = sshll.u32 %s426_s1, 4  ;;  %s31_s26 = int_to_ptr.hbm [resolvable:$true] %s30_s26 }
   0x2   :  { %14 = vsyncpa [#allocation4], 0  ;;  %s355_s27 = smov [#allocation5]   ;;  %s20_s8 = sshll.u32 %s425_s0, 4  ;;  %s21_s8 = int_to_ptr.hbm [resolvable:$true] %s20_s8 }
   0x3   :  { %s32_s28 = sshll.u32 %s355_s27, 4  ;;  %s356_s9 = smov 128   ;;  %s33_s28 = int_to_ptr.vmem [resolvable:$true] %s32_s28 }
   0x4   :  { %s357_s10 = smov 8   ;;  %s358_s11 = smov [#allocation2]  }
   0x5   :  { %38 = dma.hbm_to_vmem [thread:$0]  %s31_s26, 2048, %s33_s28, [#allocation6], %s356_s9, %s356_s9, %s357_s10  }
   0x6   :  { %s22_s12 = sshll.u32 %s358_s11, 4  ;;  %s49_s15 = sshll.u32 %s430_s5, 4  ;;  %s23_s12 = int_to_ptr.vmem [resolvable:$true] %s22_s12  ;;  %s50_s15 = int_to_ptr.hbm [resolvable:$true] %s49_s15 }
   0x7   :  { %25 = dma.hbm_to_vmem [thread:$0]  %s21_s8, 128, %s23_s12, [#allocation3]  }
   0x8   :  { %s359_s1 = smov [#allocation7]  }
   0x9   :  { %s51_s16 = sshll.u32 %s359_s1, 4  ;;  %s52_s16 = int_to_ptr.vmem [resolvable:$true] %s51_s16 }
   0xa   :  { %57 = dma.hbm_to_vmem [thread:$0]  %s50_s15, 2048, %s52_s16, [#allocation6], %s356_s9, %s356_s9, %s357_s10  }
   0xb   :  { %349 = dma.done.wait [#allocation3], 128  }
   0xc   :  { %350 = vsyncadd [#allocation3], 4294967168 }
   0xd   :  { %351 = dma.done.wait [#allocation6], 4096  }
   0xe   :  { %352 = vsyncadd [#allocation6], 4294963200  ;;  %v88_v0 = vld [vmem:[#allocation5 + $0x78] sm:$0xff]  ;;  %v87_v1 = vld [vmem:[#allocation5 + $0x70] sm:$0xff]  ;;  %s222_s24 = sshll.u32 %s432_s7, 4  ;;  %s223_s24 = int_to_ptr.hbm [resolvable:$true] %s222_s24 }
   0xf   :  { %93 = vmatpush.msra.mxu0 %v88_v0  ;;  %v86_v2 = vld [vmem:[#allocation5 + $0x68] sm:$0xff]  ;;  %v85_v3 = vld [vmem:[#allocation5 + $0x60] sm:$0xff]  ;;  %v84_v4 = vld [vmem:[#allocation5 + $0x58] sm:$0xff] }
  0x10   :  { %v83_v5 = vld [vmem:[#allocation5 + $0x50] sm:$0xff]  ;;  %v82_v6 = vld [vmem:[#allocation5 + $0x48] sm:$0xff]  ;;  %v81_v7 = vld [vmem:[#allocation5 + $0x40] sm:$0xff] }
  0x11   :  { %94 = vmatpush.msra.mxu0 %v87_v1  ;;  %v80_v8 = vld [vmem:[#allocation5 + $0x38] sm:$0xff]  ;;  %v79_v9 = vld [vmem:[#allocation5 + $0x30] sm:$0xff]  ;;  %v78_v10 = vld [vmem:[#allocation5 + $0x28] sm:$0xff] }
  0x12   :  { %v77_v11 = vld [vmem:[#allocation5 + $0x20] sm:$0xff]  ;;  %v76_v12 = vld [vmem:[#allocation5 + $0x18] sm:$0xff]  ;;  %v75_v13 = vld [vmem:[#allocation5 + $0x10] sm:$0xff] }
  0x13   :  { %95 = vmatpush.msra.mxu0 %v86_v2  ;;  %v74_v14 = vld [vmem:[#allocation5 + $0x8] sm:$0xff]  ;;  %v73_v15 = vld [vmem:[#allocation5] sm:$0xff]  ;;  %v72_v16 = vld [vmem:[#allocation2] sm:$0xff] }
  0x14   :  { %v239_v17 = vld [vmem:[%s427_s2] ss:$0 sm:$0xff]  ;;  %v178_v37 = vld [vmem:[#allocation7 + $0x70] sm:$0xff]  ;;  %v177_v38 = vld [vmem:[#allocation7 + $0x68] sm:$0xff] }
  0x15   :  { %96 = vmatpush.msra.mxu0 %v85_v3  ;;  %v179_v36 = vld [vmem:[#allocation7 + $0x78] sm:$0xff]  ;;  %v176_v39 = vld [vmem:[#allocation7 + $0x60] sm:$0xff]  ;;  %v174_v41 = vld [vmem:[#allocation7 + $0x50] sm:$0xff] }
  0x16   :  { %184 = vmatpush.msra.mxu1 %v179_v36  ;;  %v175_v40 = vld [vmem:[#allocation7 + $0x58] sm:$0xff]  ;;  %v173_v42 = vld [vmem:[#allocation7 + $0x48] sm:$0xff]  ;;  %v172_v43 = vld [vmem:[#allocation7 + $0x40] sm:$0xff] }
  0x17   :  { %97 = vmatpush.msra.mxu0 %v84_v4  ;;  %v171_v44 = vld [vmem:[#allocation7 + $0x38] sm:$0xff]  ;;  %v170_v45 = vld [vmem:[#allocation7 + $0x30] sm:$0xff]  ;;  %v169_v46 = vld [vmem:[#allocation7 + $0x28] sm:$0xff] }
  0x18   :  { %185 = vmatpush.msra.mxu1 %v178_v37  ;;  %v168_v47 = vld [vmem:[#allocation7 + $0x20] sm:$0xff]  ;;  %v167_v48 = vld [vmem:[#allocation7 + $0x18] sm:$0xff]  ;;  %v166_v49 = vld [vmem:[#allocation7 + $0x10] sm:$0xff] }
  0x19   :  { %98 = vmatpush.msra.mxu0 %v83_v5  ;;  %v165_v51 = vld [vmem:[#allocation7 + $0x8] sm:$0xff]  ;;  %v164_v52 = vld [vmem:[#allocation7] sm:$0xff]  ;;  %v240_v2 = vld [vmem:[%s428_s3] ss:$0 sm:$0xff]  ;;  %s360_s3 = smov [#allocation8]  }
  0x1a   :  { %186 = vmatpush.msra.mxu1 %v177_v38  ;;  %v241_v5 = vld [vmem:[%s429_s4] ss:$0 sm:$0xff]  ;;  %s220_s4 = sshll.u32 %s360_s3, 4  ;;  %s221_s4 = int_to_ptr.vmem [resolvable:$true] %s220_s4 }
  0x1b   :  { %99 = vmatpush.msra.mxu0 %v82_v6 }
  0x1c   :  { %187 = vmatpush.msra.mxu1 %v176_v39 }
  0x1d   :  { %100 = vmatpush.msra.mxu0 %v81_v7 }
  0x1e   :  { %188 = vmatpush.msra.mxu1 %v175_v40 }
  0x1f   :  { %101 = vmatpush.msra.mxu0 %v80_v8  ;;  %v242_v8 = vld [vmem:[%s431_s6] ss:$0 sm:$0xff] }
  0x20   :  { %189 = vmatpush.msra.mxu1 %v174_v41 }
  0x21   :  { %102 = vmatpush.msra.mxu0 %v79_v9 }
  0x22   :  { %190 = vmatpush.msra.mxu1 %v173_v42 }
  0x23   :  { %103 = vmatpush.msra.mxu0 %v78_v10 }
  0x24   :  { %191 = vmatpush.msra.mxu1 %v172_v43 }
  0x25   :  { %104 = vmatpush.msra.mxu0 %v77_v11 }
  0x26   :  { %192 = vmatpush.msra.mxu1 %v171_v44 }
  0x27   :  { %105 = vmatpush.msra.mxu0 %v76_v12 }
  0x28   :  { %193 = vmatpush.msra.mxu1 %v170_v45 }
  0x29   :  { %106 = vmatpush.msra.mxu0 %v75_v13 }
  0x2a   :  { %194 = vmatpush.msra.mxu1 %v169_v46 }
  0x2b   :  { %107 = vmatpush.msra.mxu0 %v74_v14 }
  0x2c   :  { %195 = vmatpush.msra.mxu1 %v168_v47 }
  0x2d   :  { %108 = vmatpush.msra.mxu0 %v73_v15 }
  0x2e   :  { %109 = vmatmul.f32.vlgmr.msra.gmra.mxu0 %v72_v16  ;;  %196 = vmatpush.msra.mxu1 %v167_v48 }
  0x30   :  { %197 = vmatpush.msra.mxu1 %v166_v49 }
  0x32   :  { %198 = vmatpush.msra.mxu1 %v165_v51 }
  0x34   :  { %199 = vmatpush.msra.mxu1 %v164_v52 }
  0xab   :  { %v110_v18 = vpop.f32.mrf.mxu0 }
  0xac   :  { %v111_v19 = vadd.f32 %v239_v17, %v110_v18 }
  0xae   :  { %v113_v20 = vsub.f32 0.0, %v111_v19 }
  0xb0   :  { %v114_v21 = vmul.f32 1.442695, %v113_v20 }
  0xb2   :  { %243 = vpow2.f32 %v114_v21 }
  0xb8   :  { %v244_v22 = vpop.eup %243 }
  0xb9   :  { %v116_v23 = vadd.f32 1.0, %v244_v22 }
  0xbb   :  { %245 = vrcp.f32 %v116_v23  ;;  %v128_v27 = vand.u32 2147483648, %v116_v23  ;;  %v126_v29 = vand.u32 2147483647, %v116_v23  ;;  %vm122_vm1 = vweird.f32 %v116_v23 }
  0xbd   :  { %v129_v31 = vor.u32 1.1754944e-38, %v128_v27  ;;  %vm127_vm3 = vcmp.eq.f32.partialorder %v126_v29, 8.507059e+37 }
  0xc1   :  { %v246_v24 = vpop.eup %245 }
  0xc2   :  { %v118_v25 = vmul.f32 %v246_v24, %v116_v23  ;;  %vm123_vm0 = vweird.f32 %v246_v24 }
  0xc3   :  { %vm124_vm2 = vmor %vm122_vm1, %vm123_vm0 }
  0xc4   :  { %v119_v26 = vsub.f32 1.0, %v118_v25 }
  0xc6   :  { %v120_v28 = vmul.f32 %v246_v24, %v119_v26 }
  0xc8   :  { %v121_v30 = vadd.f32 %v246_v24, %v120_v28 }
  0xca   :  { %v125_v32 = vsel %vm124_vm2, %v246_v24, %v121_v30 }
  0xcb   :  { %v130_v33 = vsel %vm127_vm3, %v129_v31, %v125_v32 }
  0xcc   :  { %v131_v34 = vmul.f32 %v130_v33, %v111_v19 }
  0xce   :  { %132 = vadd.xlane.f32.xlu0 %v131_v34  ;;  %v134_v35 = vmul.f32 %v131_v34, %v131_v34 }
  0xd6   :  { %135 = vadd.xlane.f32.xlu0 %v134_v35 }
 0x141   :  { %v133_v50 = vpop.xlane.xlu0 %132 }
 0x142   :  { %v137_v53 = vmul.f32 0.03125, %v133_v50 }
 0x144   :  { %v139_v55 = vmul.f32 %v137_v53, %v137_v53  ;;  %v141_v1 = vsub.f32 %v131_v34, %v137_v53 }
 0x149   :  { %v136_v54 = vpop.xlane.xlu0 %135 }
 0x14a   :  { %v138_v56 = vmul.f32 0.03125, %v136_v54 }
 0x14c   :  { %v140_v57 = vsub.f32 %v138_v56, %v139_v55 }
 0x14e   :  { %v142_v58 = vadd.f32 1e-05, %v140_v57 }
 0x150   :  { %247 = vrsqrt.f32 %v142_v58  ;;  %vm149_vm5 = vweird.f32 %v142_v58 }
 0x156   :  { %v248_v59 = vpop.eup %247 }
 0x157   :  { %v144_v60 = vmul.f32 %v248_v59, %v142_v58  ;;  %vm150_vm4 = vweird.f32 %v248_v59 }
 0x158   :  { %vm151_vm6 = vmor %vm149_vm5, %vm150_vm4 }
 0x159   :  { %v145_v61 = vmul.f32 %v248_v59, %v144_v60 }
 0x15b   :  { %v146_v62 = vmul.f32 0.5, %v145_v61 }
 0x15d   :  { %v147_v63 = vsub.f32 1.5, %v146_v62 }
 0x15f   :  { %v148_v0 = vmul.f32 %v248_v59, %v147_v63 }
 0x161   :  { %v152_v3 = vsel %vm151_vm6, %v248_v59, %v148_v0 }
 0x162   :  { %v153_v4 = vmul.f32 %v152_v3, %v141_v1 }
 0x164   :  { %v158_v6 = vmul.f32 %v240_v2, %v153_v4 }
 0x166   :  { %v163_v7 = vadd.f32 %v241_v5, %v158_v6 }
 0x168   :  { %200 = vmatmul.f32.vlgmr.msra.gmra.mxu1 %v163_v7 }
 0x1e5   :  { %v201_v9 = vpop.f32.mrf.mxu1 }
 0x1e6   :  { %v202_v10 = vadd.f32 %v242_v8, %v201_v9 }
 0x1e8   :  { %204 = vmax.xlane.f32.xlu1 %v202_v10 }
 0x25b   :  { %v205_v11 = vpop.xlane.xlu1 %204 }
 0x25c   :  { %v206_v12 = vsub.f32 %v202_v10, %v205_v11 }
 0x25e   :  { %v207_v13 = vmul.f32 1.442695, %v206_v12 }
 0x260   :  { %249 = vpow2.f32 %v207_v13 }
 0x266   :  { %v250_v14 = vpop.eup %249 }
 0x267   :  { %209 = vadd.xlane.f32.xlu1 %v250_v14 }
 0x2da   :  { %v210_v15 = vpop.xlane.xlu1 %209 }
 0x2db   :  { %251 = vlog2.f32 %v210_v15 }
 0x2e1   :  { %v252_v16 = vpop.eup %251 }
 0x2e2   :  { %v212_v17 = vmul.f32 0.6931472, %v252_v16 }
 0x2e4   :  { %v213_v18 = vsub.f32 %v206_v12, %v212_v17 }
 0x2e6   :  { %214 = vst [vmem:[#allocation8] sm:$0xff] %v213_v18 }
 0x2e7   :  { %225 = dma.vmem_to_hbm [thread:$0]  %s221_s4, 128, %s223_s24, [#allocation4]  }
 0x2e8   :  { %353 = dma.done.wait [#allocation4], 128  }
 0x2e9   :  { %354 = vsyncadd [#allocation4], 4294967168 }
 0x2ea   :  { %230 = vsyncpa [#allocation3], 1 }
 0x2eb   :  { %231 = vsyncpa [#allocation6], 1 }
 0x2ec   :  { %232 = vsyncpa [#allocation4], 1 }

</bundles_post_ra>
